<compile_context>
chip_gen: v6e
topology: v6e:2x2x1
jax: 0.10.0
libtpu: 0.0.40
codegen_flags: <defaults>
</compile_context>

<pallas_src>
import functools

import jax
import jax.numpy as jnp
from jax.experimental import pallas as pl
from jax.experimental.pallas import tpu as pltpu


SCORE_PAD = 128  # lane-dense padded width of the fc3 weight/bias (MXU/VMEM layout only)


def fc_hf_kernel(
    x_ref,
    dr1w_ref, dr1b_ref,
    dr2w_ref, dr2b_ref,
    dr3w_ref, dr3b_ref,
    fc1w_ref, fc1b_ref,
    fc2w_ref, fc2b_ref,
    fc3w_ref, fc3b_ref,
    score_ref, codes_ref,
):
    x = x_ref[...]                                   # f32 [TILE_B, in_dim]

    def mm(a_f32, w_ref, b_ref):
        # bf16 MXU matmul with f32 accumulation, f32 bias add.
        return jnp.dot(a_f32.astype(jnp.bfloat16), w_ref[...],
                       preferred_element_type=jnp.float32) + b_ref[...]

    # --- mask branch: dr1 -> relu -> dr2 -> relu -> dr3 (dropouts = identity) ---
    h = jnp.maximum(mm(x, dr1w_ref, dr1b_ref), 0.0)
    h = jnp.maximum(mm(h, dr2w_ref, dr2b_ref), 0.0)
    mask = mm(h, dr3w_ref, dr3b_ref)

    new_codes = mask * x
    codes_ref[...] = new_codes.astype(codes_ref.dtype)

    # --- score branch: fc1(+bn1 folded) -> relu -> fc2(+bn2 folded) -> relu -> fc3 ---
    s = jnp.maximum(mm(new_codes, fc1w_ref, fc1b_ref), 0.0)
    s = jnp.maximum(mm(s, fc2w_ref, fc2b_ref), 0.0)
    s = mm(s, fc3w_ref, fc3b_ref)                    # [TILE_B, SCORE_PAD]
    out_dim = score_ref.shape[-1]
    # Narrow (out_dim-wide) store: keeps the MXU-friendly padded weight but avoids
    # writing 128 f32 lanes per row to HBM for 2 useful columns.
    score_ref[...] = jax.nn.sigmoid(s[:, :out_dim]).astype(score_ref.dtype)


def _round_up(n, m):
    return ((n + m - 1) // m) * m


def _pick_tile(batch, tile_b):
    tb = min(tile_b, _round_up(batch, 8))
    # v7x has 2 TensorCores: when the batch is large enough that halving the tile
    # still leaves it big, keep >= 2 grid steps so the "parallel" axis splits.
    if pl.cdiv(batch, tb) < 2 and batch >= 1024:
        tb = _round_up(pl.cdiv(batch, 2), 8)
    return tb


@functools.partial(jax.jit, static_argnames=("out_dim", "tile_b", "codes_dtype"))
def fc_hf_forward(x, params, out_dim=2, tile_b=1024, codes_dtype=jnp.float32):
    B, in_dim = x.shape
    tb = _pick_tile(B, tile_b)

    args = (
        x,
        params["dr1_w"], params["dr1_b"],
        params["dr2_w"], params["dr2_b"],
        params["dr3_w"], params["dr3_b"],
        params["fc1_w"], params["fc1_b"],
        params["fc2_w"], params["fc2_b"],
        params["fc3_w"], params["fc3_b"],
    )

    def resident(a):
        # Weights / biases: same block every grid step -> DMA'd once, stays in VMEM.
        return pl.BlockSpec(a.shape, lambda i: (0, 0))

    in_specs = [pl.BlockSpec((tb, in_dim), lambda i: (i, 0))]
    in_specs += [resident(a) for a in args[1:]]

    out_specs = (
        pl.BlockSpec((tb, out_dim), lambda i: (i, 0)),   # narrow score store
        pl.BlockSpec((tb, in_dim), lambda i: (i, 0)),
    )

    score, new_codes = pl.pallas_call(
        fc_hf_kernel,
        out_shape=(
            jax.ShapeDtypeStruct((B, out_dim), jnp.float32),
            jax.ShapeDtypeStruct((B, in_dim), codes_dtype),
        ),
        grid=(pl.cdiv(B, tb),),
        in_specs=in_specs,
        out_specs=out_specs,
        compiler_params=pltpu.CompilerParams(
            dimension_semantics=("parallel",),
            vmem_limit_bytes=32 * 1024 * 1024,
        ),
    )(*args)

    return score, new_codes


def init_params(key, in_dim=128, l_dim=256, out_dim=2, eps=1e-5):
    ks = jax.random.split(key, 6)
    std = 0.01

    def w(k, fan_in, fan_out):
        # PyTorch weight is [out, in]; store transposed as [in, out] for x @ W.
        return (std * jax.random.normal(k, (fan_out, fan_in), jnp.float32)).T

    dr1_w, dr1_b = w(ks[0], in_dim, l_dim), jnp.zeros((1, l_dim), jnp.float32)
    dr2_w, dr2_b = w(ks[1], l_dim, l_dim), jnp.zeros((1, l_dim), jnp.float32)
    dr3_w, dr3_b = w(ks[2], l_dim, in_dim), jnp.zeros((1, in_dim), jnp.float32)
    fc1_w, fc1_b = w(ks[3], in_dim, l_dim), jnp.zeros((1, l_dim), jnp.float32)
    fc2_w, fc2_b = w(ks[4], l_dim, l_dim), jnp.zeros((1, l_dim), jnp.float32)
    fc3_w, fc3_b = w(ks[5], l_dim, out_dim), jnp.zeros((1, out_dim), jnp.float32)

    # BatchNorm1d eval-mode fold into the preceding linear:
    #   scale = gamma / sqrt(running_var + eps), shift = beta - running_mean * scale
    #   (at init: gamma=1, beta=0, mean=0, var=1 -> per-feature scalar)
    bn_scale = jnp.full((1, l_dim), 1.0 / jnp.sqrt(1.0 + eps), jnp.float32)
    bn_shift = jnp.zeros((1, l_dim), jnp.float32)
    fc1_w = fc1_w * bn_scale
    fc1_b = fc1_b * bn_scale + bn_shift
    fc2_w = fc2_w * bn_scale
    fc2_b = fc2_b * bn_scale + bn_shift

    # Pad fc3 to a lane-dense 128-wide weight (MXU/VMEM layout); the padded output
    # columns are computed in VMEM but never stored to HBM.
    pad = SCORE_PAD - out_dim
    fc3_w = jnp.pad(fc3_w, ((0, 0), (0, pad)))
    fc3_b = jnp.pad(fc3_b, ((0, 0), (0, pad)))

    bf = lambda a: a.astype(jnp.bfloat16)
    return {
        "dr1_w": bf(dr1_w), "dr1_b": dr1_b,
        "dr2_w": bf(dr2_w), "dr2_b": dr2_b,
        "dr3_w": bf(dr3_w), "dr3_b": dr3_b,
        "fc1_w": bf(fc1_w), "fc1_b": fc1_b,
        "fc2_w": bf(fc2_w), "fc2_b": fc2_b,
        "fc3_w": bf(fc3_w), "fc3_b": fc3_b,
    }


def reference_forward(x, p, out_dim=2):
    # Pure-JAX f32 reference using the same (BN-folded, bf16-stored) parameters.
    def lin(h, wk, bk):
        return h @ p[wk].astype(jnp.float32) + p[bk]

    h = jnp.maximum(lin(x, "dr1_w", "dr1_b"), 0.0)
    h = jnp.maximum(lin(h, "dr2_w", "dr2_b"), 0.0)
    mask = lin(h, "dr3_w", "dr3_b")
    codes = mask * x
    s = jnp.maximum(lin(codes, "fc1_w", "fc1_b"), 0.0)
    s = jnp.maximum(lin(s, "fc2_w", "fc2_b"), 0.0)
    s = lin(s, "fc3_w", "fc3_b")
    return jax.nn.sigmoid(s)[:, :out_dim], codes


if __name__ == "__main__":
    in_dim, l_dim, out_dim = 128, 256, 2

    key = jax.random.PRNGKey(0)
    k_x, k_p, k_x2 = jax.random.split(key, 3)
    params = init_params(k_p, in_dim=in_dim, l_dim=l_dim, out_dim=out_dim)

    # --- small, tile-aligned batch ---
    batch = 8
    x = jax.random.normal(k_x, (batch, in_dim), jnp.float32)
    score, new_codes = fc_hf_forward(x, params, out_dim=out_dim)
    jax.block_until_ready((score, new_codes))

    ref_score, ref_codes = reference_forward(x, params, out_dim=out_dim)
    assert score.shape == (batch, out_dim) and new_codes.shape == (batch, in_dim)
    # bf16 matmul operands (f32 accumulation) -> relaxed tolerance vs the f32 reference.
    assert jnp.allclose(score, ref_score, atol=1e-2, rtol=1e-2)
    assert jnp.allclose(new_codes, ref_codes, atol=1e-2, rtol=1e-2)

    # --- non-divisible batch + multi-step grid: guards the ragged last-block path
    #     (no wrapper-side pad/slice passes; OOB rows are discarded on store) ---
    batch2 = 13
    x2 = jax.random.normal(k_x2, (batch2, in_dim), jnp.float32)
    score2, codes2 = fc_hf_forward(x2, params, out_dim=out_dim, tile_b=8)
    jax.block_until_ready((score2, codes2))

    ref_score2, ref_codes2 = reference_forward(x2, params, out_dim=out_dim)
    assert score2.shape == (batch2, out_dim) and codes2.shape == (batch2, in_dim)
    assert jnp.allclose(score2, ref_score2, atol=1e-2, rtol=1e-2)
    assert jnp.allclose(codes2, ref_codes2, atol=1e-2, rtol=1e-2)

    print("KERNEL_OK")
</pallas_src>

<mosaic_0001>
module attributes {stable_mosaic.version = 11 : i64} {
  func.func @fc_hf_kernel(%arg0: i32, %arg1: memref<8x128xf32, #tpu.memory_space<vmem>>, %arg2: memref<128x256xbf16, #tpu.memory_space<vmem>>, %arg3: memref<1x256xf32, #tpu.memory_space<vmem>>, %arg4: memref<256x256xbf16, #tpu.memory_space<vmem>>, %arg5: memref<1x256xf32, #tpu.memory_space<vmem>>, %arg6: memref<256x128xbf16, #tpu.memory_space<vmem>>, %arg7: memref<1x128xf32, #tpu.memory_space<vmem>>, %arg8: memref<128x256xbf16, #tpu.memory_space<vmem>>, %arg9: memref<1x256xf32, #tpu.memory_space<vmem>>, %arg10: memref<256x256xbf16, #tpu.memory_space<vmem>>, %arg11: memref<1x256xf32, #tpu.memory_space<vmem>>, %arg12: memref<256x128xbf16, #tpu.memory_space<vmem>>, %arg13: memref<1x128xf32, #tpu.memory_space<vmem>>, %arg14: memref<8x2xf32, #tpu.memory_space<vmem>>, %arg15: memref<8x128xf32, #tpu.memory_space<vmem>>) attributes {dimension_semantics = [#tpu.dimension_semantics<parallel>], iteration_bounds = array<i64: 1>, scalar_prefetch = 0 : i64, scratch_operands = 0 : i64, tpu.core_type = #tpu.core_type<tc>, window_params = [{transform_indices = @transform_0, window_bounds = array<i64: 8, 128>}, {pipeline_mode = #tpu.pipeline_mode<synchronous>, transform_indices = @transform_1, window_bounds = array<i64: 128, 256>}, {pipeline_mode = #tpu.pipeline_mode<synchronous>, transform_indices = @transform_2, window_bounds = array<i64: 1, 256>}, {pipeline_mode = #tpu.pipeline_mode<synchronous>, transform_indices = @transform_3, window_bounds = array<i64: 256, 256>}, {pipeline_mode = #tpu.pipeline_mode<synchronous>, transform_indices = @transform_4, window_bounds = array<i64: 1, 256>}, {pipeline_mode = #tpu.pipeline_mode<synchronous>, transform_indices = @transform_5, window_bounds = array<i64: 256, 128>}, {pipeline_mode = #tpu.pipeline_mode<synchronous>, transform_indices = @transform_6, window_bounds = array<i64: 1, 128>}, {pipeline_mode = #tpu.pipeline_mode<synchronous>, transform_indices = @transform_7, window_bounds = array<i64: 128, 256>}, {pipeline_mode = #tpu.pipeline_mode<synchronous>, transform_indices = @transform_8, window_bounds = array<i64: 1, 256>}, {pipeline_mode = #tpu.pipeline_mode<synchronous>, transform_indices = @transform_9, window_bounds = array<i64: 256, 256>}, {pipeline_mode = #tpu.pipeline_mode<synchronous>, transform_indices = @transform_10, window_bounds = array<i64: 1, 256>}, {pipeline_mode = #tpu.pipeline_mode<synchronous>, transform_indices = @transform_11, window_bounds = array<i64: 256, 128>}, {pipeline_mode = #tpu.pipeline_mode<synchronous>, transform_indices = @transform_12, window_bounds = array<i64: 1, 128>}, {transform_indices = @transform_13, window_bounds = array<i64: 8, 2>}, {transform_indices = @transform_14, window_bounds = array<i64: 8, 128>}]} {
    %c0 = arith.constant 0 : index
    %c0_0 = arith.constant 0 : index
    %0 = vector.load %arg1[%c0, %c0_0] : memref<8x128xf32, #tpu.memory_space<vmem>>, vector<8x128xf32>
    %1 = arith.truncf %0 : vector<8x128xf32> to vector<8x128xbf16>
    %c0_1 = arith.constant 0 : index
    %c0_2 = arith.constant 0 : index
    %2 = vector.load %arg2[%c0_1, %c0_2] : memref<128x256xbf16, #tpu.memory_space<vmem>>, vector<128x256xbf16>
    %cst = arith.constant dense<0.000000e+00> : vector<8x256xf32>
    %3 = tpu.matmul %1, %2, %cst {dimension_numbers = #tpu.dot_dimension_numbers<[1], [0], [0], [1], [0, 0, 1, 1], [], []>} : vector<8x128xbf16>, vector<128x256xbf16>, vector<8x256xf32> -> vector<8x256xf32>
    %c0_3 = arith.constant 0 : index
    %c0_4 = arith.constant 0 : index
    %4 = vector.load %arg3[%c0_3, %c0_4] : memref<1x256xf32, #tpu.memory_space<vmem>>, vector<1x256xf32>
    %5 = vector.broadcast %4 : vector<1x256xf32> to vector<8x256xf32>
    %6 = arith.addf %3, %5 : vector<8x256xf32>
    %cst_5 = arith.constant 0.000000e+00 : f32
    %7 = vector.broadcast %cst_5 : f32 to vector<8x256xf32>
    %8 = arith.maximumf %6, %7 : vector<8x256xf32>
    %9 = arith.truncf %8 : vector<8x256xf32> to vector<8x256xbf16>
    %c0_6 = arith.constant 0 : index
    %c0_7 = arith.constant 0 : index
    %10 = vector.load %arg4[%c0_6, %c0_7] : memref<256x256xbf16, #tpu.memory_space<vmem>>, vector<256x256xbf16>
    %cst_8 = arith.constant dense<0.000000e+00> : vector<8x256xf32>
    %11 = tpu.matmul %9, %10, %cst_8 {dimension_numbers = #tpu.dot_dimension_numbers<[1], [0], [0], [1], [0, 0, 1, 1], [], []>} : vector<8x256xbf16>, vector<256x256xbf16>, vector<8x256xf32> -> vector<8x256xf32>
    %c0_9 = arith.constant 0 : index
    %c0_10 = arith.constant 0 : index
    %12 = vector.load %arg5[%c0_9, %c0_10] : memref<1x256xf32, #tpu.memory_space<vmem>>, vector<1x256xf32>
    %13 = vector.broadcast %12 : vector<1x256xf32> to vector<8x256xf32>
    %14 = arith.addf %11, %13 : vector<8x256xf32>
    %cst_11 = arith.constant 0.000000e+00 : f32
    %15 = vector.broadcast %cst_11 : f32 to vector<8x256xf32>
    %16 = arith.maximumf %14, %15 : vector<8x256xf32>
    %17 = arith.truncf %16 : vector<8x256xf32> to vector<8x256xbf16>
    %c0_12 = arith.constant 0 : index
    %c0_13 = arith.constant 0 : index
    %18 = vector.load %arg6[%c0_12, %c0_13] : memref<256x128xbf16, #tpu.memory_space<vmem>>, vector<256x128xbf16>
    %cst_14 = arith.constant dense<0.000000e+00> : vector<8x128xf32>
    %19 = tpu.matmul %17, %18, %cst_14 {dimension_numbers = #tpu.dot_dimension_numbers<[1], [0], [0], [1], [0, 0, 1, 1], [], []>} : vector<8x256xbf16>, vector<256x128xbf16>, vector<8x128xf32> -> vector<8x128xf32>
    %c0_15 = arith.constant 0 : index
    %c0_16 = arith.constant 0 : index
    %20 = vector.load %arg7[%c0_15, %c0_16] : memref<1x128xf32, #tpu.memory_space<vmem>>, vector<1x128xf32>
    %21 = vector.broadcast %20 : vector<1x128xf32> to vector<8x128xf32>
    %22 = arith.addf %19, %21 : vector<8x128xf32>
    %23 = arith.mulf %22, %0 : vector<8x128xf32>
    %c0_17 = arith.constant 0 : index
    %c0_18 = arith.constant 0 : index
    %24 = vector.load %arg15[%c0_17, %c0_18] : memref<8x128xf32, #tpu.memory_space<vmem>>, vector<8x128xf32>
    tpu.vector_store %arg15[%c0_17, %c0_18], %23 {strides = array<i32>} : memref<8x128xf32, #tpu.memory_space<vmem>>, vector<8x128xf32>,
    %25 = arith.truncf %23 : vector<8x128xf32> to vector<8x128xbf16>
    %c0_19 = arith.constant 0 : index
    %c0_20 = arith.constant 0 : index
    %26 = vector.load %arg8[%c0_19, %c0_20] : memref<128x256xbf16, #tpu.memory_space<vmem>>, vector<128x256xbf16>
    %cst_21 = arith.constant dense<0.000000e+00> : vector<8x256xf32>
    %27 = tpu.matmul %25, %26, %cst_21 {dimension_numbers = #tpu.dot_dimension_numbers<[1], [0], [0], [1], [0, 0, 1, 1], [], []>} : vector<8x128xbf16>, vector<128x256xbf16>, vector<8x256xf32> -> vector<8x256xf32>
    %c0_22 = arith.constant 0 : index
    %c0_23 = arith.constant 0 : index
    %28 = vector.load %arg9[%c0_22, %c0_23] : memref<1x256xf32, #tpu.memory_space<vmem>>, vector<1x256xf32>
    %29 = vector.broadcast %28 : vector<1x256xf32> to vector<8x256xf32>
    %30 = arith.addf %27, %29 : vector<8x256xf32>
    %cst_24 = arith.constant 0.000000e+00 : f32
    %31 = vector.broadcast %cst_24 : f32 to vector<8x256xf32>
    %32 = arith.maximumf %30, %31 : vector<8x256xf32>
    %33 = arith.truncf %32 : vector<8x256xf32> to vector<8x256xbf16>
    %c0_25 = arith.constant 0 : index
    %c0_26 = arith.constant 0 : index
    %34 = vector.load %arg10[%c0_25, %c0_26] : memref<256x256xbf16, #tpu.memory_space<vmem>>, vector<256x256xbf16>
    %cst_27 = arith.constant dense<0.000000e+00> : vector<8x256xf32>
    %35 = tpu.matmul %33, %34, %cst_27 {dimension_numbers = #tpu.dot_dimension_numbers<[1], [0], [0], [1], [0, 0, 1, 1], [], []>} : vector<8x256xbf16>, vector<256x256xbf16>, vector<8x256xf32> -> vector<8x256xf32>
    %c0_28 = arith.constant 0 : index
    %c0_29 = arith.constant 0 : index
    %36 = vector.load %arg11[%c0_28, %c0_29] : memref<1x256xf32, #tpu.memory_space<vmem>>, vector<1x256xf32>
    %37 = vector.broadcast %36 : vector<1x256xf32> to vector<8x256xf32>
    %38 = arith.addf %35, %37 : vector<8x256xf32>
    %cst_30 = arith.constant 0.000000e+00 : f32
    %39 = vector.broadcast %cst_30 : f32 to vector<8x256xf32>
    %40 = arith.maximumf %38, %39 : vector<8x256xf32>
    %41 = arith.truncf %40 : vector<8x256xf32> to vector<8x256xbf16>
    %c0_31 = arith.constant 0 : index
    %c0_32 = arith.constant 0 : index
    %42 = vector.load %arg12[%c0_31, %c0_32] : memref<256x128xbf16, #tpu.memory_space<vmem>>, vector<256x128xbf16>
    %cst_33 = arith.constant dense<0.000000e+00> : vector<8x128xf32>
    %43 = tpu.matmul %41, %42, %cst_33 {dimension_numbers = #tpu.dot_dimension_numbers<[1], [0], [0], [1], [0, 0, 1, 1], [], []>} : vector<8x256xbf16>, vector<256x128xbf16>, vector<8x128xf32> -> vector<8x128xf32>
    %c0_34 = arith.constant 0 : index
    %c0_35 = arith.constant 0 : index
    %44 = vector.load %arg13[%c0_34, %c0_35] : memref<1x128xf32, #tpu.memory_space<vmem>>, vector<1x128xf32>
    %45 = vector.broadcast %44 : vector<1x128xf32> to vector<8x128xf32>
    %46 = arith.addf %43, %45 : vector<8x128xf32>
    %47 = vector.extract_strided_slice %46 {offsets = [0, 0], sizes = [8, 2], strides = [1, 1]} : vector<8x128xf32> to vector<8x2xf32>
    %48 = arith.negf %47 : vector<8x2xf32>
    %49 = math.exp %48 : vector<8x2xf32>
    %cst_36 = arith.constant 1.000000e+00 : f32
    %50 = vector.broadcast %cst_36 : f32 to vector<8x2xf32>
    %51 = arith.addf %50, %49 : vector<8x2xf32>
    %52 = arith.divf %50, %51 : vector<8x2xf32>
    %c0_37 = arith.constant 0 : index
    %c0_38 = arith.constant 0 : index
    %53 = vector.load %arg14[%c0_37, %c0_38] : memref<8x2xf32, #tpu.memory_space<vmem>>, vector<8x2xf32>
    tpu.vector_store %arg14[%c0_37, %c0_38], %52 {strides = array<i32>} : memref<8x2xf32, #tpu.memory_space<vmem>>, vector<8x2xf32>,
    return
  }
  func.func @transform_0(%arg0: i32) -> (i32, i32) {
    %c0_i32 = arith.constant 0 : i32
    %c0_i32_0 = arith.constant 0 : i32
    return %arg0, %c0_i32 : i32, i32
  }
  func.func @transform_1(%arg0: i32) -> (i32, i32) {
    %c0_i32 = arith.constant 0 : i32
    %c0_i32_0 = arith.constant 0 : i32
    %c0_i32_1 = arith.constant 0 : i32
    return %c0_i32, %c0_i32_0 : i32, i32
  }
  func.func @transform_2(%arg0: i32) -> (i32, i32) {
    %c0_i32 = arith.constant 0 : i32
    %c0_i32_0 = arith.constant 0 : i32
    %c0_i32_1 = arith.constant 0 : i32
    return %c0_i32, %c0_i32_0 : i32, i32
  }
  func.func @transform_3(%arg0: i32) -> (i32, i32) {
    %c0_i32 = arith.constant 0 : i32
    %c0_i32_0 = arith.constant 0 : i32
    %c0_i32_1 = arith.constant 0 : i32
    return %c0_i32, %c0_i32_0 : i32, i32
  }
  func.func @transform_4(%arg0: i32) -> (i32, i32) {
    %c0_i32 = arith.constant 0 : i32
    %c0_i32_0 = arith.constant 0 : i32
    %c0_i32_1 = arith.constant 0 : i32
    return %c0_i32, %c0_i32_0 : i32, i32
  }
  func.func @transform_5(%arg0: i32) -> (i32, i32) {
    %c0_i32 = arith.constant 0 : i32
    %c0_i32_0 = arith.constant 0 : i32
    %c0_i32_1 = arith.constant 0 : i32
    return %c0_i32, %c0_i32_0 : i32, i32
  }
  func.func @transform_6(%arg0: i32) -> (i32, i32) {
    %c0_i32 = arith.constant 0 : i32
    %c0_i32_0 = arith.constant 0 : i32
    %c0_i32_1 = arith.constant 0 : i32
    return %c0_i32, %c0_i32_0 : i32, i32
  }
  func.func @transform_7(%arg0: i32) -> (i32, i32) {
    %c0_i32 = arith.constant 0 : i32
    %c0_i32_0 = arith.constant 0 : i32
    %c0_i32_1 = arith.constant 0 : i32
    return %c0_i32, %c0_i32_0 : i32, i32
  }
  func.func @transform_8(%arg0: i32) -> (i32, i32) {
    %c0_i32 = arith.constant 0 : i32
    %c0_i32_0 = arith.constant 0 : i32
    %c0_i32_1 = arith.constant 0 : i32
    return %c0_i32, %c0_i32_0 : i32, i32
  }
  func.func @transform_9(%arg0: i32) -> (i32, i32) {
    %c0_i32 = arith.constant 0 : i32
    %c0_i32_0 = arith.constant 0 : i32
    %c0_i32_1 = arith.constant 0 : i32
    return %c0_i32, %c0_i32_0 : i32, i32
  }
  func.func @transform_10(%arg0: i32) -> (i32, i32) {
    %c0_i32 = arith.constant 0 : i32
    %c0_i32_0 = arith.constant 0 : i32
    %c0_i32_1 = arith.constant 0 : i32
    return %c0_i32, %c0_i32_0 : i32, i32
  }
  func.func @transform_11(%arg0: i32) -> (i32, i32) {
    %c0_i32 = arith.constant 0 : i32
    %c0_i32_0 = arith.constant 0 : i32
    %c0_i32_1 = arith.constant 0 : i32
    return %c0_i32, %c0_i32_0 : i32, i32
  }
  func.func @transform_12(%arg0: i32) -> (i32, i32) {
    %c0_i32 = arith.constant 0 : i32
    %c0_i32_0 = arith.constant 0 : i32
    %c0_i32_1 = arith.constant 0 : i32
    return %c0_i32, %c0_i32_0 : i32, i32
  }
  func.func @transform_13(%arg0: i32) -> (i32, i32) {
    %c0_i32 = arith.constant 0 : i32
    %c0_i32_0 = arith.constant 0 : i32
    return %arg0, %c0_i32 : i32, i32
  }
  func.func @transform_14(%arg0: i32) -> (i32, i32) {
    %c0_i32 = arith.constant 0 : i32
    %c0_i32_0 = arith.constant 0 : i32
    return %arg0, %c0_i32 : i32, i32
  }
}

</mosaic_0001>

<bundles_post_ra>
// kernel: fc_hf_forward.1
= control target key start
LH: loop header
LB: loop body
LE: loop exit
PB: predicated region body
PF: predicated region fallthrough
CT: control target
= control target key end

     0   :  { %20 = vsyncpa [#allocation3], 0  ;;  %s2069_s0 = inlined_call_operand.hbm [shape: f32[8,128], index: 0, kind: input, shape index: {}]   ;;  %s2070_s1 = inlined_call_operand.hbm [shape: bf16[128,256], index: 1, kind: input, shape index: {}]   ;;  %s2071_s2 = inlined_call_operand.hbm [shape: f32[1,256], index: 2, kind: input, shape index: {}]   ;;  %s2072_s3 = inlined_call_operand.hbm [shape: bf16[256,256], index: 3, kind: input, shape index: {}]   ;;  %s2073_s4 = inlined_call_operand.vmem [shape: f32[1,256], index: 4, kind: input, shape index: {}]   ;;  %s2074_s5 = inlined_call_operand.hbm [shape: bf16[256,128], index: 5, kind: input, shape index: {}]   ;;  %s2075_s6 = inlined_call_operand.vmem [shape: f32[1,128], index: 6, kind: input, shape index: {}]   ;;  %s2076_s7 = inlined_call_operand.hbm [shape: bf16[128,256], index: 7, kind: input, shape index: {}]   ;;  %s2077_s8 = inlined_call_operand.vmem [shape: f32[1,256], index: 8, kind: input, shape index: {}]   ;;  %s2078_s9 = inlined_call_operand.hbm [shape: bf16[256,256], index: 9, kind: input, shape index: {}]   ;;  %s2079_s10 = inlined_call_operand.vmem [shape: f32[1,256], index: 10, kind: input, shape index: {}]   ;;  %s2080_s11 = inlined_call_operand.hbm [shape: bf16[256,128], index: 11, kind: input, shape index: {}]   ;;  %s2081_s12 = inlined_call_operand.vmem [shape: f32[1,128], index: 12, kind: input, shape index: {}]   ;;  %s2082_s13 = inlined_call_operand.vmem [shape: f32[8,2], index: 13, kind: output, shape index: {0}]   ;;  %s2083_s14 = inlined_call_operand.hbm [shape: f32[8,128], index: 14, kind: output, shape index: {1}]  }
   0x1   :  { %21 = vsyncpa [#allocation6], 0 }
   0x2   :  { %22 = vsyncpa [#allocation9], 0 }
   0x3   :  { %23 = vsyncpa [#allocation12], 0 }
   0x4   :  { %24 = vsyncpa [#allocation15], 0 }
   0x5   :  { %25 = vsyncpa [#allocation4], 0  ;;  %s1904_s29 = smov [#allocation5]  }
   0x6   :  { %s41_s30 = sshll.u32 %s1904_s29, 4  ;;  %s42_s30 = int_to_ptr.vmem [resolvable:$true] %s41_s30 }
   0x7   :  { %s1720_s15 = scalar_lea.vmem %s42_s30, 2048  ;;  %p1725_p1 = scmp.lt.s32.totalorder %s42_s30, %s42_s30 }
   0x8   :  { %p1721_p0 = scmp.ne.s32.totalorder %s42_s30, %s1720_s15  ;;  %p1726_p2 = scmp.lt.s32.totalorder %s1720_s15, %s1720_s15 }
   0xa   :  { %p1727_p3 = por %p1726_p2, %p1725_p1 }
   0xc   :  { %p1728_p4 = pnand %p1727_p3, %p1721_p0 }
   0xe   :  { %1731 = shalt.err (!%p1728_p4)
}
   0xf   :  { %s1905_s16 = smov 128   ;;  %s1906_s17 = smov 8  }
  0x10   :  { %47 = dma.hbm_to_vmem [thread:$0]  %s2070_s1, 2048, %s42_s30, [#allocation6], %s1905_s16, %s1905_s16, %s1906_s17  }
  0x11   :  { %s1907_s20 = smov [#allocation8]   ;;  %s1908_s22 = smov [#allocation11]  }
  0x12   :  { %s63_s21 = sshll.u32 %s1907_s20, 4  ;;  %s91_s23 = sshll.u32 %s1908_s22, 4  ;;  %s64_s21 = int_to_ptr.vmem [resolvable:$true] %s63_s21  ;;  %s92_s23 = int_to_ptr.vmem [resolvable:$true] %s91_s23 }
  0x13   :  { %s1740_s24 = scalar_lea.vmem %s64_s21, 4096  ;;  %p1745_p6 = scmp.lt.s32.totalorder %s64_s21, %s64_s21 }
  0x14   :  { %p1741_p5 = scmp.ne.s32.totalorder %s64_s21, %s1740_s24  ;;  %p1746_p7 = scmp.lt.s32.totalorder %s1740_s24, %s1740_s24 }
  0x16   :  { %p1747_p8 = por %p1746_p7, %p1745_p6 }
  0x18   :  { %p1748_p9 = pnand %p1747_p8, %p1741_p5 }
  0x1a   :  { %1751 = shalt.err (!%p1748_p9)
}
  0x1b   :  { %69 = dma.hbm_to_vmem [thread:$0]  %s2072_s3, 4096, %s64_s21, [#allocation9], %s1905_s16, %s1905_s16, %s1906_s17  }
  0x1c   :  { %s1760_s1 = scalar_lea.vmem %s92_s23, 2048  ;;  %p1765_p11 = scmp.lt.s32.totalorder %s92_s23, %s92_s23 }
  0x1d   :  { %p1761_p10 = scmp.ne.s32.totalorder %s92_s23, %s1760_s1  ;;  %p1766_p12 = scmp.lt.s32.totalorder %s1760_s1, %s1760_s1 }
  0x1f   :  { %p1767_p13 = por %p1766_p12, %p1765_p11 }
  0x21   :  { %p1768_p0 = pnand %p1767_p13, %p1761_p10 }
  0x23   :  { %1771 = shalt.err (!%p1768_p0)
}
  0x24   :  { %97 = dma.hbm_to_vmem [thread:$0]  %s2076_s7, 2048, %s92_s23, [#allocation12], %s1905_s16, %s1905_s16, %s1906_s17  }
  0x25   :  { %s1909_s29 = smov [#allocation2]   ;;  %s1910_s15 = smov [#allocation7]  }
  0x26   :  { %s32_s30 = sshll.u32 %s1909_s29, 4  ;;  %s54_s3 = sshll.u32 %s1910_s15, 4  ;;  %s33_s30 = int_to_ptr.vmem [resolvable:$true] %s32_s30  ;;  %s55_s3 = int_to_ptr.vmem [resolvable:$true] %s54_s3 }
  0x27   :  { %s1780_s18 = scalar_lea.vmem %s33_s30, 128  ;;  %p1785_p2 = scmp.lt.s32.totalorder %s33_s30, %s33_s30 }
  0x28   :  { %p1781_p1 = scmp.ne.s32.totalorder %s33_s30, %s1780_s18  ;;  %p1786_p3 = scmp.lt.s32.totalorder %s1780_s18, %s1780_s18 }
  0x2a   :  { %p1787_p4 = por %p1786_p3, %p1785_p2 }
  0x2c   :  { %p1788_p5 = pnand %p1787_p4, %p1781_p1 }
  0x2e   :  { %1791 = shalt.err (!%p1788_p5)
}
  0x2f   :  { %35 = dma.hbm_to_vmem [thread:$0]  %s2069_s0, 128, %s33_s30, [#allocation3]  }
  0x30   :  { %s1800_s21 = scalar_lea.vmem %s55_s3, 32  ;;  %p1805_p7 = scmp.lt.s32.totalorder %s55_s3, %s55_s3 }
  0x31   :  { %p1801_p6 = scmp.ne.s32.totalorder %s55_s3, %s1800_s21  ;;  %p1806_p8 = scmp.lt.s32.totalorder %s1800_s21, %s1800_s21 }
  0x33   :  { %p1807_p9 = por %p1806_p8, %p1805_p7 }
  0x35   :  { %p1808_p10 = pnand %p1807_p9, %p1801_p6 }
  0x37   :  { %1811 = shalt.err (!%p1808_p10)
}
  0x38   :  { %57 = dma.hbm_to_vmem [thread:$0]  %s2071_s2, 32, %s55_s3, [#allocation6]  }
  0x39   :  { %s1911_s23 = smov [#allocation10]  }
  0x3a   :  { %s77_s24 = sshll.u32 %s1911_s23, 4  ;;  %s78_s24 = int_to_ptr.vmem [resolvable:$true] %s77_s24 }
  0x3b   :  { %s1820_s25 = scalar_lea.vmem %s78_s24, 2048  ;;  %p1825_p12 = scmp.lt.s32.totalorder %s78_s24, %s78_s24 }
  0x3c   :  { %p1821_p11 = scmp.ne.s32.totalorder %s78_s24, %s1820_s25  ;;  %p1826_p13 = scmp.lt.s32.totalorder %s1820_s25, %s1820_s25 }
  0x3e   :  { %p1827_p0 = por %p1826_p13, %p1825_p12 }
  0x40   :  { %p1828_p1 = pnand %p1827_p0, %p1821_p11 }
  0x42   :  { %1831 = shalt.err (!%p1828_p1)
}
  0x43   :  { %s1912_s0 = smov 64   ;;  %s1913_s26 = smov 4  }
  0x44   :  { %83 = dma.hbm_to_vmem [thread:$0]  %s2074_s5, 2048, %s78_s24, [#allocation9], %s1912_s0, %s1912_s0, %s1913_s26  }
  0x45   :  { %s1914_s28 = smov [#allocation13]   ;;  %s1915_s30 = smov [#allocation14]  }
  0x46   :  { %s105_s29 = sshll.u32 %s1914_s28, 4  ;;  %s119_s2 = sshll.u32 %s1915_s30, 4  ;;  %s106_s29 = int_to_ptr.vmem [resolvable:$true] %s105_s29  ;;  %s120_s2 = int_to_ptr.vmem [resolvable:$true] %s119_s2 }
  0x47   :  { %s1840_s15 = scalar_lea.vmem %s106_s29, 4096  ;;  %p1845_p3 = scmp.lt.s32.totalorder %s106_s29, %s106_s29 }
  0x48   :  { %p1841_p2 = scmp.ne.s32.totalorder %s106_s29, %s1840_s15  ;;  %p1846_p4 = scmp.lt.s32.totalorder %s1840_s15, %s1840_s15 }
  0x4a   :  { %p1847_p5 = por %p1846_p4, %p1845_p3 }
  0x4c   :  { %p1848_p6 = pnand %p1847_p5, %p1841_p2 }
  0x4e   :  { %1851 = shalt.err (!%p1848_p6)
}
  0x4f   :  { %111 = dma.hbm_to_vmem [thread:$0]  %s2078_s9, 4096, %s106_s29, [#allocation12], %s1905_s16, %s1905_s16, %s1906_s17  }
  0x50   :  { %s1860_s5 = scalar_lea.vmem %s120_s2, 2048  ;;  %p1865_p8 = scmp.lt.s32.totalorder %s120_s2, %s120_s2 }
  0x51   :  { %p1861_p7 = scmp.ne.s32.totalorder %s120_s2, %s1860_s5  ;;  %p1866_p9 = scmp.lt.s32.totalorder %s1860_s5, %s1860_s5 }
  0x53   :  { %p1867_p10 = por %p1866_p9, %p1865_p8 }
  0x55   :  { %p1868_p11 = pnand %p1867_p10, %p1861_p7 }
  0x57   :  { %1871 = shalt.err (!%p1868_p11)
}
  0x58   :  { %125 = dma.hbm_to_vmem [thread:$0]  %s2080_s11, 2048, %s120_s2, [#allocation15], %s1912_s0, %s1912_s0, %s1913_s26  }
  0x59   :  { %1892 = dma.done.wait [#allocation3], 128  }
  0x5a   :  { %1893 = vsyncadd [#allocation3], 4294967168 }
  0x5b   :  { %1894 = dma.done.wait [#allocation6], 2080  }
  0x5c   :  { %1895 = vsyncadd [#allocation6], 4294965216 }
  0x5d   :  { %1896 = dma.done.wait [#allocation9], 6144  }
  0x5e   :  { %1897 = vsyncadd [#allocation9], 4294961152 }
  0x5f   :  { %1898 = dma.done.wait [#allocation12], 6144  }
  0x60   :  { %1899 = vsyncadd [#allocation12], 4294961152 }
  0x61   :  { %1900 = dma.done.wait [#allocation15], 2048  }
  0x62   :  { %1901 = vsyncadd [#allocation15], 4294965248  ;;  %v1916_v0 = vmov 0   ;;  %v1532_v1 = vld [vmem:[#allocation5 + $0x74] ss:$8 sps:$4 sm:$0xff]   ;;  %v1608_v55 = vld [vmem:[#allocation10 + $0x68] sm:$0xff]   ;;  %v173_v63 = vlaneseq }
  0x63   :  { %295 = vmatprep.mubr.bf16.mxu0 %v1916_v0  ;;  %v1534_v2 = vld [vmem:[#allocation5 + $0x70] ss:$8 sps:$4 sm:$0xff]   ;;  %263 = vmatprep.subr.bf16.mxu0 %v1532_v1  ;;  %v1535_v3 = vld [vmem:[#allocation5 + $0x64] ss:$8 sps:$4 sm:$0xff]   ;;  %v1537_v4 = vld [vmem:[#allocation5 + $0x60] ss:$8 sps:$4 sm:$0xff]  }
  0x64   :  { %264 = vmatpush1.bf16.msra.mxu0 %v1534_v2  ;;  %v1538_v5 = vld [vmem:[#allocation5 + $0x54] ss:$8 sps:$4 sm:$0xff]   ;;  %v1540_v6 = vld [vmem:[#allocation5 + $0x50] ss:$8 sps:$4 sm:$0xff]   ;;  %v1541_v7 = vld [vmem:[#allocation5 + $0x44] ss:$8 sps:$4 sm:$0xff]  }
  0x65   :  { %265 = vmatprep.subr.bf16.mxu0 %v1535_v3  ;;  %v1543_v8 = vld [vmem:[#allocation5 + $0x40] ss:$8 sps:$4 sm:$0xff]   ;;  %v1544_v9 = vld [vmem:[#allocation5 + $0x34] ss:$8 sps:$4 sm:$0xff]   ;;  %v1546_v13 = vld [vmem:[#allocation5 + $0x30] ss:$8 sps:$4 sm:$0xff]  }
  0x66   :  { %v1556_v10 = vld [vmem:[#allocation8 + $0x74] ss:$8 sps:$4 sm:$0xff]   ;;  %v1558_v11 = vld [vmem:[#allocation8 + $0x70] ss:$8 sps:$4 sm:$0xff]   ;;  %v1559_v12 = vld [vmem:[#allocation8 + $0x64] ss:$8 sps:$4 sm:$0xff]  }
  0x67   :  { %512 = vmatprep.subr.bf16.mxu1 %v1556_v10  ;;  %v1561_v14 = vld [vmem:[#allocation8 + $0x60] ss:$8 sps:$4 sm:$0xff]   ;;  %v1562_v15 = vld [vmem:[#allocation8 + $0x54] ss:$8 sps:$4 sm:$0xff]   ;;  %v1564_v18 = vld [vmem:[#allocation8 + $0x50] ss:$8 sps:$4 sm:$0xff]  }
  0x68   :  { %266 = vmatpush1.bf16.msra.mxu0 %v1537_v4  ;;  %513 = vmatpush1.bf16.msra.mxu1 %v1558_v11  ;;  %v1547_v16 = vld [vmem:[#allocation5 + $0x24] ss:$8 sps:$4 sm:$0xff]   ;;  %v1549_v17 = vld [vmem:[#allocation5 + $0x20] ss:$8 sps:$4 sm:$0xff]   ;;  %v1550_v20 = vld [vmem:[#allocation5 + $0x14] ss:$8 sps:$4 sm:$0xff]  }
  0x69   :  { %267 = vmatprep.subr.bf16.mxu0 %v1538_v5  ;;  %514 = vmatprep.subr.bf16.mxu1 %v1559_v12  ;;  %v1565_v19 = vld [vmem:[#allocation8 + $0x44] ss:$8 sps:$4 sm:$0xff]   ;;  %v1567_v22 = vld [vmem:[#allocation8 + $0x40] ss:$8 sps:$4 sm:$0xff]   ;;  %v1568_v23 = vld [vmem:[#allocation8 + $0x34] ss:$8 sps:$4 sm:$0xff]  }
  0x6a   :  { %v1552_v21 = vld [vmem:[#allocation5 + $0x10] ss:$8 sps:$4 sm:$0xff]   ;;  %v1553_v24 = vld [vmem:[#allocation5 + $0x4] ss:$8 sps:$4 sm:$0xff]   ;;  %v1555_v25 = vld [vmem:[#allocation5] ss:$8 sps:$4 sm:$0xff]  }
  0x6b   :  { %v2030_v26 = vld [vmem:[#allocation2] sm:$0xff]  ;;  %v1571_v28 = vld [vmem:[#allocation8 + $0x24] ss:$8 sps:$4 sm:$0xff]   ;;  %v1573_v29 = vld [vmem:[#allocation8 + $0x20] ss:$8 sps:$4 sm:$0xff]   ;;  %v174_v1 = vshrl.u32 %v173_v63, 7 }
  0x6c   :  { %268 = vmatpush1.bf16.msra.mxu0 %v1540_v6  ;;  %515 = vmatpush1.bf16.msra.mxu1 %v1561_v14  ;;  %v1570_v27 = vld [vmem:[#allocation8 + $0x30] ss:$8 sps:$4 sm:$0xff]   ;;  %v1574_v30 = vld [vmem:[#allocation8 + $0x14] ss:$8 sps:$4 sm:$0xff]   ;;  %v154_v31 = vpack.c.bf16 %v2030_v26, %v2030_v26  ;;  %v1577_v33 = vld [vmem:[#allocation8 + $0x4] ss:$8 sps:$4 sm:$0xff]  }
  0x6d   :  { %269 = vmatprep.subr.bf16.mxu0 %v1541_v7  ;;  %516 = vmatprep.subr.bf16.mxu1 %v1562_v15  ;;  %v1576_v32 = vld [vmem:[#allocation8 + $0x10] ss:$8 sps:$4 sm:$0xff]   ;;  %v1579_v34 = vld [vmem:[#allocation8] ss:$8 sps:$4 sm:$0xff]   ;;  %v1580_v35 = vld [vmem:[#allocation8 + $0xf4] ss:$8 sps:$4 sm:$0xff]  }
  0x6e   :  { %v1582_v36 = vld [vmem:[#allocation8 + $0xf0] ss:$8 sps:$4 sm:$0xff]   ;;  %v1583_v37 = vld [vmem:[#allocation8 + $0xe4] ss:$8 sps:$4 sm:$0xff]   ;;  %v1585_v38 = vld [vmem:[#allocation8 + $0xe0] ss:$8 sps:$4 sm:$0xff]  }
  0x6f   :  { %v1586_v39 = vld [vmem:[#allocation8 + $0xd4] ss:$8 sps:$4 sm:$0xff]   ;;  %v1588_v40 = vld [vmem:[#allocation8 + $0xd0] ss:$8 sps:$4 sm:$0xff]   ;;  %v1589_v41 = vld [vmem:[#allocation8 + $0xc4] ss:$8 sps:$4 sm:$0xff]  }
  0x70   :  { %270 = vmatpush1.bf16.msra.mxu0 %v1543_v8  ;;  %517 = vmatpush1.bf16.msra.mxu1 %v1564_v18  ;;  %v1591_v42 = vld [vmem:[#allocation8 + $0xc0] ss:$8 sps:$4 sm:$0xff]   ;;  %v1592_v43 = vld [vmem:[#allocation8 + $0xb4] ss:$8 sps:$4 sm:$0xff]   ;;  %v1594_v44 = vld [vmem:[#allocation8 + $0xb0] ss:$8 sps:$4 sm:$0xff]  }
  0x71   :  { %271 = vmatprep.subr.bf16.mxu0 %v1544_v9  ;;  %518 = vmatprep.subr.bf16.mxu1 %v1565_v19  ;;  %v1595_v45 = vld [vmem:[#allocation8 + $0xa4] ss:$8 sps:$4 sm:$0xff]   ;;  %v1597_v46 = vld [vmem:[#allocation8 + $0xa0] ss:$8 sps:$4 sm:$0xff]   ;;  %v1598_v47 = vld [vmem:[#allocation8 + $0x94] ss:$8 sps:$4 sm:$0xff]  }
  0x72   :  { %v1600_v48 = vld [vmem:[#allocation8 + $0x90] ss:$8 sps:$4 sm:$0xff]   ;;  %v1601_v49 = vld [vmem:[#allocation8 + $0x84] ss:$8 sps:$4 sm:$0xff]   ;;  %v1603_v50 = vld [vmem:[#allocation8 + $0x80] ss:$8 sps:$4 sm:$0xff]  }
  0x73   :  { %v1604_v51 = vld [vmem:[#allocation10 + $0x78] sm:$0xff]   ;;  %v1606_v53 = vld [vmem:[#allocation10 + $0x70] sm:$0xff]   ;;  %v1609_v56 = vld [vmem:[#allocation10 + $0x28] sm:$0xff]   ;;  %v2034_v2 = vsub.s32 0, %v174_v1  ;;  %v2036_v4 = vsub.s32 1, %v174_v1  ;;  %s1917_s7 = smov [#allocation16]  }
  0x74   :  { %272 = vmatpush1.bf16.msra.mxu0 %v1546_v13  ;;  %519 = vmatpush1.bf16.msra.mxu1 %v1567_v22  ;;  %v1605_v52 = vld [vmem:[#allocation10 + $0x38] sm:$0xff]   ;;  %v1607_v54 = vld [vmem:[#allocation10 + $0x30] sm:$0xff]   ;;  %v1610_v57 = vld [vmem:[#allocation10 + $0x60] sm:$0xff]   ;;  %s1328_s22 = sshll.u32 %s1917_s7, 4  ;;  %s1329_s22 = int_to_ptr.vmem [resolvable:$true] %s1328_s22 }
  0x75   :  { %273 = vmatprep.subr.bf16.mxu0 %v1547_v16  ;;  %520 = vmatprep.subr.bf16.mxu1 %v1568_v23  ;;  %v1611_v58 = vld [vmem:[#allocation10 + $0x20] sm:$0xff]   ;;  %v1612_v59 = vld [vmem:[#allocation10 + $0x58] sm:$0xff]   ;;  %v1614_v61 = vld [vmem:[#allocation10 + $0x50] sm:$0xff]   ;;  %p1877_p13 = scmp.lt.s32.totalorder %s1329_s22, %s1329_s22 }
  0x76   :  { %v1613_v60 = vld [vmem:[#allocation10 + $0x18] sm:$0xff]   ;;  %v1615_v62 = vld [vmem:[#allocation10 + $0x10] sm:$0xff]   ;;  %v1617_v18 = vld [vmem:[#allocation10 + $0x8] sm:$0xff]  }
  0x77   :  { %v171_v3 = vld [vmem:[#allocation7] sm:$0x3]  ;;  %v1618_v19 = vld [vmem:[#allocation10 + $0x40] sm:$0xff]   ;;  %v340_v22 = vld [vmem:[%s2073_s4] sm:$0x3] }
  0x78   :  { %274 = vmatpush1.bf16.msra.mxu0 %v1549_v17  ;;  %521 = vmatpush1.bf16.msra.mxu1 %v1570_v27  ;;  %v176_v5 = vrot.slane %v171_v3, %v2034_v2  ;;  %v180_v6 = vrot.slane %v171_v3, %v2036_v4  ;;  %v1616_v17 = vld [vmem:[#allocation10 + $0x48] sm:$0xff]   ;;  %v345_v23 = vrot.slane %v340_v22, %v2034_v2  ;;  %v1662_v63 = vld [vmem:[#allocation13 + $0x10] ss:$8 sps:$4 sm:$0xff]  }
  0x79   :  { %275 = vmatprep.subr.bf16.mxu0 %v1550_v20  ;;  %522 = vmatprep.subr.bf16.mxu1 %v1571_v28  ;;  %v1619_v20 = vld [vmem:[#allocation10] sm:$0xff]  }
  0x7a   :  { %v1667_v1 = vld [vmem:[#allocation13 + $0x4] ss:$8 sps:$4 sm:$0xff]   ;;  %v1665_v3 = vld [vmem:[#allocation13] ss:$8 sps:$4 sm:$0xff]  }
  0x7c   :  { %276 = vmatpush1.bf16.msra.mxu0 %v1552_v21  ;;  %523 = vmatpush1.bf16.msra.mxu1 %v1573_v29  ;;  %v1622_v21 = vld [vmem:[#allocation11 + $0x74] ss:$8 sps:$4 sm:$0xff]  }
  0x7d   :  { %277 = vmatprep.subr.bf16.mxu0 %v1553_v24  ;;  %524 = vmatprep.subr.bf16.mxu1 %v1574_v30  ;;  %v349_v24 = vrot.slane %v340_v22, %v2036_v4 }
  0x80   :  { %278 = vmatpush1.bf16.msra.mxu0 %v1555_v25  ;;  %525 = vmatpush1.bf16.msra.mxu1 %v1576_v32 }
  0x81   :  { %526 = vmatprep.subr.bf16.mxu1 %v1577_v33  ;;  %1474 = vmatprep.subr.bf16.mxu0 %v1604_v51  ;;  %v1646_v51 = vld [vmem:[#allocation13 + $0x74] ss:$8 sps:$4 sm:$0xff]  }
  0x83   :  { %296 = vmatmul.mubr.bf16.vlgmr.msra.gmra.mxu0 %v154_v31 }
  0x84   :  { %527 = vmatpush1.bf16.msra.mxu1 %v1579_v34  ;;  %1475 = vmatpush3.bf16.msra.mxu0 %v1605_v52  ;;  %v1649_v52 = vld [vmem:[#allocation13 + $0x64] ss:$8 sps:$4 sm:$0xff]  }
  0x85   :  { %528 = vmatprep.subr.bf16.mxu1 %v1580_v35  ;;  %1476 = vmatprep.subr.bf16.mxu0 %v1606_v53  ;;  %v1620_v35 = vld [vmem:[#allocation11 + $0x70] ss:$8 sps:$4 sm:$0xff]   ;;  %v1647_v53 = vld [vmem:[#allocation13 + $0x60] ss:$8 sps:$4 sm:$0xff]  }
  0x88   :  { %529 = vmatpush2.bf16.msra.mxu1 %v1582_v36  ;;  %1477 = vmatpush3.bf16.msra.mxu0 %v1607_v54  ;;  %v1652_v54 = vld [vmem:[#allocation13 + $0x54] ss:$8 sps:$4 sm:$0xff]  }
  0x89   :  { %530 = vmatprep.subr.bf16.mxu1 %v1583_v37  ;;  %1478 = vmatprep.subr.bf16.mxu0 %v1608_v55  ;;  %v1625_v37 = vld [vmem:[#allocation11 + $0x64] ss:$8 sps:$4 sm:$0xff]   ;;  %v1650_v55 = vld [vmem:[#allocation13 + $0x50] ss:$8 sps:$4 sm:$0xff]  }
  0x8c   :  { %531 = vmatpush2.bf16.msra.mxu1 %v1585_v38  ;;  %1479 = vmatpush3.bf16.msra.mxu0 %v1609_v56  ;;  %v1623_v38 = vld [vmem:[#allocation11 + $0x60] ss:$8 sps:$4 sm:$0xff]   ;;  %v1655_v56 = vld [vmem:[#allocation13 + $0x44] ss:$8 sps:$4 sm:$0xff]  }
  0x8d   :  { %532 = vmatprep.subr.bf16.mxu1 %v1586_v39  ;;  %1480 = vmatprep.subr.bf16.mxu0 %v1610_v57  ;;  %v1628_v39 = vld [vmem:[#allocation11 + $0x54] ss:$8 sps:$4 sm:$0xff]   ;;  %v1653_v57 = vld [vmem:[#allocation13 + $0x40] ss:$8 sps:$4 sm:$0xff]  }
  0x90   :  { %533 = vmatpush2.bf16.msra.mxu1 %v1588_v40  ;;  %1481 = vmatpush3.bf16.msra.mxu0 %v1611_v58  ;;  %v1626_v40 = vld [vmem:[#allocation11 + $0x50] ss:$8 sps:$4 sm:$0xff]   ;;  %v1658_v58 = vld [vmem:[#allocation13 + $0x34] ss:$8 sps:$4 sm:$0xff]  }
  0x91   :  { %534 = vmatprep.subr.bf16.mxu1 %v1589_v41  ;;  %1482 = vmatprep.subr.bf16.mxu0 %v1612_v59  ;;  %v1631_v41 = vld [vmem:[#allocation11 + $0x44] ss:$8 sps:$4 sm:$0xff]   ;;  %v1656_v59 = vld [vmem:[#allocation13 + $0x30] ss:$8 sps:$4 sm:$0xff]  }
  0x94   :  { %535 = vmatpush2.bf16.msra.mxu1 %v1591_v42  ;;  %1483 = vmatpush3.bf16.msra.mxu0 %v1613_v60  ;;  %v1629_v42 = vld [vmem:[#allocation11 + $0x40] ss:$8 sps:$4 sm:$0xff]   ;;  %v1661_v60 = vld [vmem:[#allocation13 + $0x24] ss:$8 sps:$4 sm:$0xff]  }
  0x95   :  { %536 = vmatprep.subr.bf16.mxu1 %v1592_v43  ;;  %1484 = vmatprep.subr.bf16.mxu0 %v1614_v61  ;;  %v1634_v43 = vld [vmem:[#allocation11 + $0x34] ss:$8 sps:$4 sm:$0xff]   ;;  %v1659_v61 = vld [vmem:[#allocation13 + $0x20] ss:$8 sps:$4 sm:$0xff]  }
  0x98   :  { %537 = vmatpush2.bf16.msra.mxu1 %v1594_v44  ;;  %1485 = vmatpush3.bf16.msra.mxu0 %v1615_v62  ;;  %v1632_v44 = vld [vmem:[#allocation11 + $0x30] ss:$8 sps:$4 sm:$0xff]   ;;  %v1664_v62 = vld [vmem:[#allocation13 + $0x14] ss:$8 sps:$4 sm:$0xff]  }
  0x99   :  { %538 = vmatprep.subr.bf16.mxu1 %v1595_v45  ;;  %1486 = vmatprep.subr.bf16.mxu0 %v1616_v17  ;;  %v1637_v45 = vld [vmem:[#allocation11 + $0x24] ss:$8 sps:$4 sm:$0xff]  }
  0x9c   :  { %539 = vmatpush2.bf16.msra.mxu1 %v1597_v46  ;;  %1487 = vmatpush3.bf16.msra.mxu0 %v1617_v18  ;;  %v1635_v46 = vld [vmem:[#allocation11 + $0x20] ss:$8 sps:$4 sm:$0xff]   ;;  %v1391_v18 = vld [vmem:[%s2075_s6] ss:$0 sm:$0xff] }
  0x9d   :  { %540 = vmatprep.subr.bf16.mxu1 %v1598_v47  ;;  %1488 = vmatprep.subr.bf16.mxu0 %v1618_v19  ;;  %v1640_v47 = vld [vmem:[#allocation11 + $0x14] ss:$8 sps:$4 sm:$0xff]  }
  0xa0   :  { %541 = vmatpush2.bf16.msra.mxu1 %v1600_v48  ;;  %1489 = vmatpush3.bf16.msra.mxu0 %v1619_v20  ;;  %v1643_v48 = vld [vmem:[#allocation11 + $0x4] ss:$8 sps:$4 sm:$0xff]  }
  0xa1   :  { %542 = vmatprep.subr.bf16.mxu1 %v1601_v49  ;;  %843 = vmatprep.subr.bf16.mxu0 %v1622_v21  ;;  %v1641_v49 = vld [vmem:[#allocation11] ss:$8 sps:$4 sm:$0xff]  }
  0xa4   :  { %543 = vmatpush2.bf16.msra.mxu1 %v1603_v50  ;;  %v1644_v50 = vld [vmem:[#allocation13 + $0x70] ss:$8 sps:$4 sm:$0xff]  }
  0xa5   :  { %1092 = vmatprep.subr.bf16.mxu1 %v1646_v51 }
 0x143   :  { %v297_v7 = vpop.f32.mrf.mxu0 }
 0x144   :  { %v298_v8 = vadd.f32 %v297_v7, %v176_v5  ;;  %v1670_v5 = vld [vmem:[#allocation13 + $0xf4] ss:$8 sps:$4 sm:$0xff]   ;;  %v1673_v7 = vld [vmem:[#allocation13 + $0xe4] ss:$8 sps:$4 sm:$0xff]  }
 0x145   :  { %v299_v9 = vpop.f32.mrf.mxu0 }
 0x146   :  { %v300_v10 = vadd.f32 %v299_v9, %v180_v6  ;;  %v304_v11 = vmax.f32 %v298_v8, 0.0  ;;  %v1668_v6 = vld [vmem:[#allocation13 + $0xf0] ss:$8 sps:$4 sm:$0xff]   ;;  %v1671_v8 = vld [vmem:[#allocation13 + $0xe0] ss:$8 sps:$4 sm:$0xff]  }
 0x147   :  { %v301_v12 = vpop.f32.mrf.mxu0  ;;  %v1676_v9 = vld [vmem:[#allocation13 + $0xd4] ss:$8 sps:$4 sm:$0xff]  }
 0x148   :  { %v305_v13 = vmax.f32 %v300_v10, 0.0  ;;  %v306_v16 = vpack.c.bf16 %v304_v11, %v304_v11  ;;  %v1674_v10 = vld [vmem:[#allocation13 + $0xd0] ss:$8 sps:$4 sm:$0xff]   ;;  %v1679_v11 = vld [vmem:[#allocation13 + $0xc4] ss:$8 sps:$4 sm:$0xff]  }
 0x149   :  { %v302_v14 = vpop.f32.mrf.mxu0  ;;  %v1677_v12 = vld [vmem:[#allocation13 + $0xc0] ss:$8 sps:$4 sm:$0xff]  }
 0x14a   :  { %v307_v15 = vpack.c.bf16 %v305_v13, %v305_v13  ;;  %v1682_v13 = vld [vmem:[#allocation13 + $0xb4] ss:$8 sps:$4 sm:$0xff]   ;;  %v1680_v14 = vld [vmem:[#allocation13 + $0xb0] ss:$8 sps:$4 sm:$0xff]  }
 0x14c   :  { %544 = vmatprep.mubr.bf16.mxu1 %v307_v15  ;;  %v1685_v15 = vld [vmem:[#allocation13 + $0xa4] ss:$8 sps:$4 sm:$0xff]  }
 0x14d   :  { %545 = vmatmul.mubr.bf16.vlgmr.msra.gmra.mxu1 %v306_v16  ;;  %v1683_v16 = vld [vmem:[#allocation13 + $0xa0] ss:$8 sps:$4 sm:$0xff]  }
 0x14e   :  { %1093 = vmatpush1.bf16.msra.mxu1 %v1644_v50 }
 0x14f   :  { %1094 = vmatprep.subr.bf16.mxu1 %v1649_v52 }
 0x152   :  { %1095 = vmatpush1.bf16.msra.mxu1 %v1647_v53 }
 0x153   :  { %1096 = vmatprep.subr.bf16.mxu1 %v1652_v54  ;;  %v1704_v54 = vld [vmem:[#allocation14 + $0x48] sm:$0xff]  }
 0x156   :  { %1097 = vmatpush1.bf16.msra.mxu1 %v1650_v55  ;;  %v1705_v55 = vld [vmem:[#allocation14 + $0x8] sm:$0xff]  }
 0x157   :  { %1098 = vmatprep.subr.bf16.mxu1 %v1655_v56  ;;  %v1706_v56 = vld [vmem:[#allocation14 + $0x40] sm:$0xff]  }
 0x15a   :  { %1099 = vmatpush1.bf16.msra.mxu1 %v1653_v57  ;;  %v1707_v57 = vld [vmem:[#allocation14] sm:$0xff]  }
 0x15b   :  { %1100 = vmatprep.subr.bf16.mxu1 %v1658_v58  ;;  %v920_v58 = vld [vmem:[%s2079_s10] sm:$0x3]  ;;  %s1872_s10 = scalar_lea.vmem %s1329_s22, 128 }
 0x15c   :  { %p1873_p12 = scmp.ne.s32.totalorder %s1329_s22, %s1872_s10  ;;  %p1878_p0 = scmp.lt.s32.totalorder %s1872_s10, %s1872_s10 }
 0x15e   :  { %1101 = vmatpush1.bf16.msra.mxu1 %v1656_v59  ;;  %v925_v59 = vrot.slane %v920_v58, %v2034_v2  ;;  %p1879_p1 = por %p1878_p0, %p1877_p13 }
 0x15f   :  { %1102 = vmatprep.subr.bf16.mxu1 %v1661_v60  ;;  %v929_v60 = vrot.slane %v920_v58, %v2036_v4 }
 0x160   :  { %p1880_p2 = pnand %p1879_p1, %p1873_p12 }
 0x162   :  { %1103 = vmatpush1.bf16.msra.mxu1 %v1659_v61 }
 0x163   :  { %1104 = vmatprep.subr.bf16.mxu1 %v1664_v62 }
 0x166   :  { %1105 = vmatpush1.bf16.msra.mxu1 %v1662_v63 }
 0x167   :  { %1106 = vmatprep.subr.bf16.mxu1 %v1667_v1 }
 0x16a   :  { %1107 = vmatpush1.bf16.msra.mxu1 %v1665_v3 }
 0x16b   :  { %1108 = vmatprep.subr.bf16.mxu1 %v1670_v5 }
 0x16e   :  { %1109 = vmatpush2.bf16.msra.mxu1 %v1668_v6 }
 0x16f   :  { %1110 = vmatprep.subr.bf16.mxu1 %v1673_v7 }
 0x172   :  { %1111 = vmatpush2.bf16.msra.mxu1 %v1671_v8 }
 0x173   :  { %1112 = vmatprep.subr.bf16.mxu1 %v1676_v9 }
 0x176   :  { %1113 = vmatpush2.bf16.msra.mxu1 %v1674_v10 }
 0x177   :  { %1114 = vmatprep.subr.bf16.mxu1 %v1679_v11 }
 0x17a   :  { %1115 = vmatpush2.bf16.msra.mxu1 %v1677_v12 }
 0x17b   :  { %1116 = vmatprep.subr.bf16.mxu1 %v1682_v13 }
 0x17e   :  { %1117 = vmatpush2.bf16.msra.mxu1 %v1680_v14 }
 0x17f   :  { %1118 = vmatprep.subr.bf16.mxu1 %v1685_v15 }
 0x182   :  { %1119 = vmatpush2.bf16.msra.mxu1 %v1683_v16 }
 0x20d   :  { %v546_v25 = vpop.f32.mrf.mxu1 }
 0x20e   :  { %v547_v27 = vadd.f32 %v546_v25, %v345_v23 }
 0x20f   :  { %v548_v28 = vpop.f32.mrf.mxu1 }
 0x210   :  { %v549_v29 = vadd.f32 %v548_v28, %v349_v24  ;;  %v553_v30 = vmax.f32 %v547_v27, 0.0  ;;  %v1688_v27 = vld [vmem:[#allocation13 + $0x94] ss:$8 sps:$4 sm:$0xff]   ;;  %v1686_v28 = vld [vmem:[#allocation13 + $0x90] ss:$8 sps:$4 sm:$0xff]  }
 0x211   :  { %v550_v31 = vpop.f32.mrf.mxu1  ;;  %1120 = vmatprep.subr.bf16.mxu1 %v1688_v27 }
 0x212   :  { %v554_v32 = vmax.f32 %v549_v29, 0.0  ;;  %v555_v36 = vpack.c.bf16 %v553_v30, %v553_v30  ;;  %1121 = vmatpush2.bf16.msra.mxu1 %v1686_v28  ;;  %v1691_v29 = vld [vmem:[#allocation13 + $0x84] ss:$8 sps:$4 sm:$0xff]   ;;  %v1689_v30 = vld [vmem:[#allocation13 + $0x80] ss:$8 sps:$4 sm:$0xff]   ;;  %v1692_v31 = vld [vmem:[#allocation14 + $0x78] sm:$0xff]  }
 0x213   :  { %v551_v33 = vpop.f32.mrf.mxu1  ;;  %1122 = vmatprep.subr.bf16.mxu1 %v1691_v29 }
 0x214   :  { %v556_v34 = vpack.c.bf16 %v554_v32, %v554_v32  ;;  %v1693_v32 = vld [vmem:[#allocation14 + $0x38] sm:$0xff]   ;;  %v1694_v33 = vld [vmem:[#allocation14 + $0x70] sm:$0xff]  }
 0x216   :  { %724 = vmatprep.mubr.bf16.mxu0 %v556_v34  ;;  %1123 = vmatpush2.bf16.msra.mxu1 %v1689_v30  ;;  %v1695_v34 = vld [vmem:[#allocation14 + $0x30] sm:$0xff]  }
 0x217   :  { %725 = vmatmul.mubr.bf16.vlgmr.msra.gmra.mxu0 %v555_v36  ;;  %v1698_v36 = vld [vmem:[#allocation14 + $0x60] sm:$0xff]  }
 0x218   :  { %844 = vmatpush1.bf16.msra.mxu0 %v1620_v35  ;;  %875 = vmatprep.mubr.bf16.mxu0 %v1916_v0  ;;  %v1638_v0 = vld [vmem:[#allocation11 + $0x10] ss:$8 sps:$4 sm:$0xff]   ;;  %v1696_v35 = vld [vmem:[#allocation14 + $0x68] sm:$0xff]  }
 0x219   :  { %845 = vmatprep.subr.bf16.mxu0 %v1625_v37  ;;  %v1699_v37 = vld [vmem:[#allocation14 + $0x20] sm:$0xff]  }
 0x21c   :  { %846 = vmatpush1.bf16.msra.mxu0 %v1623_v38  ;;  %v1700_v38 = vld [vmem:[#allocation14 + $0x58] sm:$0xff]  }
 0x21d   :  { %847 = vmatprep.subr.bf16.mxu0 %v1628_v39  ;;  %v1701_v39 = vld [vmem:[#allocation14 + $0x18] sm:$0xff]  }
 0x220   :  { %848 = vmatpush1.bf16.msra.mxu0 %v1626_v40  ;;  %v1702_v40 = vld [vmem:[#allocation14 + $0x50] sm:$0xff]  }
 0x221   :  { %849 = vmatprep.subr.bf16.mxu0 %v1631_v41  ;;  %v1703_v41 = vld [vmem:[#allocation14 + $0x10] sm:$0xff]  }
 0x224   :  { %850 = vmatpush1.bf16.msra.mxu0 %v1629_v42  ;;  %v751_v42 = vld [vmem:[%s2077_s8] sm:$0x3] }
 0x225   :  { %851 = vmatprep.subr.bf16.mxu0 %v1634_v43  ;;  %v756_v43 = vrot.slane %v751_v42, %v2034_v2 }
 0x228   :  { %852 = vmatpush1.bf16.msra.mxu0 %v1632_v44  ;;  %v760_v44 = vrot.slane %v751_v42, %v2036_v4 }
 0x229   :  { %853 = vmatprep.subr.bf16.mxu0 %v1637_v45 }
 0x22c   :  { %854 = vmatpush1.bf16.msra.mxu0 %v1635_v46 }
 0x22d   :  { %855 = vmatprep.subr.bf16.mxu0 %v1640_v47 }
 0x230   :  { %856 = vmatpush1.bf16.msra.mxu0 %v1638_v0 }
 0x231   :  { %857 = vmatprep.subr.bf16.mxu0 %v1643_v48 }
 0x234   :  { %858 = vmatpush1.bf16.msra.mxu0 %v1641_v49 }
 0x235   :  { %1496 = vmatprep.subr.bf16.mxu0 %v1692_v31 }
 0x2d7   :  { %v1490_v17 = vpop.f32.mrf.mxu0 }
 0x2d9   :  { %v1491_v19 = vpop.f32.mrf.mxu0 }
 0x2da   :  { %v1492_v20 = vadd.f32 %v1491_v19, %v1490_v17 }
 0x2db   :  { %v1493_v21 = vpop.f32.mrf.mxu0 }
 0x2dc   :  { %v727_v22 = vadd.f32 %v1492_v20, %v1391_v18 }
 0x2dd   :  { %v1494_v23 = vpop.f32.mrf.mxu0 }
 0x2de   :  { %v732_v24 = vmul.f32 %v727_v22, %v2030_v26  ;;  %v1697_v26 = vld [vmem:[#allocation14 + $0x28] sm:$0xff]  }
 0x2e0   :  { %v734_v25 = vpack.c.bf16 %v732_v24, %v732_v24  ;;  %733 = vst [vmem:[#allocation16] sm:$0xff] %v732_v24 }
 0x2e2   :  { %876 = vmatmul.mubr.bf16.vlgmr.msra.gmra.mxu0 %v734_v25 }
 0x2e3   :  { %1497 = vmatpush3.bf16.msra.mxu0 %v1693_v32 }
 0x2e4   :  { %1498 = vmatprep.subr.bf16.mxu0 %v1694_v33 }
 0x2e7   :  { %1499 = vmatpush3.bf16.msra.mxu0 %v1695_v34 }
 0x2e8   :  { %1500 = vmatprep.subr.bf16.mxu0 %v1696_v35 }
 0x2eb   :  { %1501 = vmatpush3.bf16.msra.mxu0 %v1697_v26 }
 0x2ec   :  { %1502 = vmatprep.subr.bf16.mxu0 %v1698_v36 }
 0x2ef   :  { %1503 = vmatpush3.bf16.msra.mxu0 %v1699_v37 }
 0x2f0   :  { %1504 = vmatprep.subr.bf16.mxu0 %v1700_v38 }
 0x2f3   :  { %1505 = vmatpush3.bf16.msra.mxu0 %v1701_v39 }
 0x2f4   :  { %1506 = vmatprep.subr.bf16.mxu0 %v1702_v40 }
 0x2f7   :  { %1507 = vmatpush3.bf16.msra.mxu0 %v1703_v41 }
 0x2f8   :  { %1508 = vmatprep.subr.bf16.mxu0 %v1704_v54 }
 0x2fb   :  { %1509 = vmatpush3.bf16.msra.mxu0 %v1705_v55 }
 0x2fc   :  { %1510 = vmatprep.subr.bf16.mxu0 %v1706_v56 }
 0x2ff   :  { %1511 = vmatpush3.bf16.msra.mxu0 %v1707_v57 }
 0x3a2   :  { %v877_v45 = vpop.f32.mrf.mxu0 }
 0x3a3   :  { %v878_v46 = vadd.f32 %v877_v45, %v756_v43 }
 0x3a4   :  { %v879_v47 = vpop.f32.mrf.mxu0 }
 0x3a5   :  { %v880_v0 = vadd.f32 %v879_v47, %v760_v44  ;;  %v884_v48 = vmax.f32 %v878_v46, 0.0 }
 0x3a6   :  { %v881_v49 = vpop.f32.mrf.mxu0 }
 0x3a7   :  { %v885_v50 = vmax.f32 %v880_v0, 0.0  ;;  %v886_v53 = vpack.c.bf16 %v884_v48, %v884_v48 }
 0x3a8   :  { %v882_v51 = vpop.f32.mrf.mxu0 }
 0x3a9   :  { %v887_v52 = vpack.c.bf16 %v885_v50, %v885_v50 }
 0x3ab   :  { %1124 = vmatprep.mubr.bf16.mxu1 %v887_v52 }
 0x3ac   :  { %1125 = vmatmul.mubr.bf16.vlgmr.msra.gmra.mxu1 %v886_v53 }
 0x46c   :  { %v1126_v61 = vpop.f32.mrf.mxu1 }
 0x46d   :  { %v1127_v62 = vadd.f32 %v1126_v61, %v925_v59 }
 0x46e   :  { %v1128_v63 = vpop.f32.mrf.mxu1 }
 0x46f   :  { %v1129_v1 = vadd.f32 %v1128_v63, %v929_v60  ;;  %v1133_v3 = vmax.f32 %v1127_v62, 0.0 }
 0x470   :  { %v1130_v5 = vpop.f32.mrf.mxu1 }
 0x471   :  { %v1134_v6 = vmax.f32 %v1129_v1, 0.0  ;;  %v1135_v9 = vpack.c.bf16 %v1133_v3, %v1133_v3 }
 0x472   :  { %v1131_v7 = vpop.f32.mrf.mxu1 }
 0x473   :  { %v1136_v8 = vpack.c.bf16 %v1134_v6, %v1134_v6 }
 0x475   :  { %1304 = vmatprep.mubr.bf16.mxu0 %v1136_v8 }
 0x476   :  { %1305 = vmatmul.mubr.bf16.vlgmr.msra.gmra.mxu0 %v1135_v9 }
 0x477   :  { %1883 = shalt.err (!%p1880_p2)
}
 0x478   :  { %1331 = dma.vmem_to_hbm [thread:$0]  %s1329_s22, 128, %s2083_s14, [#allocation4]   ;;  %v1456_v4 = vld [vmem:[%s2081_s12] ss:$0 sm:$0xff]  ;;  %vm1318_vm0 = vcmask 15360  }
 0x536   :  { %v1512_v2 = vpop.f32.mrf.mxu0 }
 0x538   :  { %v1513_v10 = vpop.f32.mrf.mxu0 }
 0x539   :  { %v1514_v11 = vadd.f32 %v1513_v10, %v1512_v2 }
 0x53a   :  { %v1515_v12 = vpop.f32.mrf.mxu0 }
 0x53b   :  { %v1307_v13 = vadd.f32 %v1514_v11, %v1456_v4 }
 0x53c   :  { %v1516_v14 = vpop.f32.mrf.mxu0 }
 0x53d   :  { %v1473_v15 = vmul.f32 -1.442695, %v1307_v13 }
 0x53f   :  { %1708 = vpow2.f32 %v1473_v15 }
 0x54c   :  { %v1709_v16 = vpop.eup %1708 }
 0x54d   :  { %v1315_v17 = vadd.f32 1.0, %v1709_v16 }
 0x54f   :  { %1710 = vrcp.f32 %v1315_v17 }
 0x55c   :  { %v1711_v18 = vpop.eup %1710 }
 0x55d   :  { %1319 = vst.msk [vmem:[%s2082_s13] sm:$0xff] %vm1318_vm0, %v1711_v18 }
 0x55e   :  { %1902 = dma.done.wait [#allocation4], 128  }
 0x55f   :  { %1903 = vsyncadd [#allocation4], 4294967168 }
 0x560   :  { %1337 = vsyncpa [#allocation3], 1 }
 0x561   :  { %1338 = vsyncpa [#allocation6], 1 }
 0x562   :  { %1339 = vsyncpa [#allocation9], 1 }
 0x563   :  { %1340 = vsyncpa [#allocation12], 1 }
 0x564   :  { %1341 = vsyncpa [#allocation15], 1 }
 0x565   :  { %1342 = vsyncpa [#allocation4], 1 }

</bundles_post_ra>
